<compile_context>
chip_gen: v6e
topology: v6e:2x2x1
jax: 0.10.0
libtpu: 0.0.40
codegen_flags: <defaults>
</compile_context>

<pallas_src>
import functools

import jax
import jax.numpy as jnp
from jax.experimental import pallas as pl
from jax.experimental.pallas import tpu as pltpu


def filter_layer_kernel(x_ref, w1_ref, b1_ref, w2_ref, b2_ref, out_ref,
                        sum_acc, max_acc, *, inv_hw, hw, hw_tile):
    i = pl.program_id(1)                       # spatial-chunk index (innermost)

    @pl.when(i == 0)
    def _init():
        sum_acc[...] = jnp.zeros_like(sum_acc)
        max_acc[...] = jnp.full_like(max_acc, -jnp.inf)

    chunk = x_ref[...]                         # (1, C, hw_tile) f32

    if hw % hw_tile != 0:
        # Tail chunk: mask lanes past H*W so they don't corrupt sum / max.
        lane = jax.lax.broadcasted_iota(jnp.int32, chunk.shape, dimension=2)
        valid = (lane + i * hw_tile) < hw
        chunk_for_sum = jnp.where(valid, chunk, 0.0)
        chunk_for_max = jnp.where(valid, chunk, -jnp.inf)
    else:
        chunk_for_sum = chunk
        chunk_for_max = chunk

    # Fused partial reductions over the lane (spatial) axis.
    sum_acc[...] = sum_acc[...] + jnp.sum(chunk_for_sum, axis=-1)      # (1, C)
    max_acc[...] = jnp.maximum(max_acc[...], jnp.max(chunk_for_max, axis=-1))

    @pl.when(i == pl.num_programs(1) - 1)
    def _finalize():
        # mean + max pooled descriptor for this batch element.
        y = sum_acc[...] * inv_hw + max_acc[...]                       # (1, C)
        # fc[0] Linear + fc[1] ReLU
        h = jnp.dot(y, w1_ref[...], preferred_element_type=jnp.float32)
        h = jnp.maximum(h + b1_ref[...], 0.0)
        # fc[2] Linear + fc[3] Sigmoid
        o = jnp.dot(h, w2_ref[...], preferred_element_type=jnp.float32)
        o = jax.nn.sigmoid(o + b2_ref[...])                            # (1, out_pad)
        out_ref[0] = o.astype(out_ref.dtype)


def _pick_hw_tile(hw, c, vmem_budget_bytes=8 * 1024 * 1024):
    """Largest lane tile whose double-buffered f32 block fits the budget."""
    max_tile = vmem_budget_bytes // (2 * 4 * max(c, 1))
    max_tile = max(128, (max_tile // 128) * 128)   # lane-aligned
    if hw <= max_tile:
        return hw                                  # full spatial dim in one block
    return max_tile


def filter_layer(x, w1, b1, w2, b2, out_planes):
    """x: (B, C, H, W) NCHW float32. Returns (B, out_planes, 1, 1)."""
    B, C, H, W = x.shape
    hidden = w1.shape[1]
    HW = H * W

    x_flat = x.reshape(B, C, HW)                   # spatial on the lane axis

    hw_tile = _pick_hw_tile(HW, C)
    num_chunks = pl.cdiv(HW, hw_tile)

    # Pad the output feature dim to a 128-lane multiple (lane-dense stores);
    # padded columns carry zero weights/bias and are sliced off below.
    out_pad = ((out_planes + 127) // 128) * 128
    pad_o = out_pad - out_planes
    w2_p = jnp.pad(w2, ((0, 0), (0, pad_o))) if pad_o else w2
    b2_p = jnp.pad(b2, ((0, pad_o),)) if pad_o else b2

    b1_2d = b1.reshape(1, hidden)
    b2_2d = b2_p.reshape(1, out_pad)

    kernel = functools.partial(
        filter_layer_kernel, inv_hw=1.0 / float(HW), hw=HW, hw_tile=hw_tile)

    out = pl.pallas_call(
        kernel,
        out_shape=jax.ShapeDtypeStruct((B, 1, out_pad), jnp.float32),
        grid_spec=pltpu.PrefetchScalarGridSpec(
            num_scalar_prefetch=0,
            grid=(B, num_chunks),                  # batch outer, reduction inner
            in_specs=[
                # Streamed activation chunks: (1, C, hw_tile)
                pl.BlockSpec((1, C, hw_tile), lambda b, i: (b, 0, i)),
                # Tiny MLP params: resident, block index never changes.
                pl.BlockSpec((C, hidden), lambda b, i: (0, 0)),
                pl.BlockSpec((1, hidden), lambda b, i: (0, 0)),
                pl.BlockSpec((hidden, out_pad), lambda b, i: (0, 0)),
                pl.BlockSpec((1, out_pad), lambda b, i: (0, 0)),
            ],
            out_specs=pl.BlockSpec((1, 1, out_pad), lambda b, i: (b, 0, 0)),
            scratch_shapes=[
                pltpu.VMEM((1, C), jnp.float32),   # running sum
                pltpu.VMEM((1, C), jnp.float32),   # running max
            ],
        ),
        compiler_params=pltpu.CompilerParams(
            dimension_semantics=("parallel", "arbitrary")),
    )(x_flat, w1, b1_2d, w2_p, b2_2d)

    return out[:, 0, :out_planes].reshape(B, out_planes, 1, 1)


def init_params(key, in_planes, out_planes, reduction=16):
    """Deterministic PyTorch-Linear-style init (uniform +-1/sqrt(fan_in))."""
    hidden = out_planes // reduction
    k1, k2, k3, k4 = jax.random.split(key, 4)
    bound1 = 1.0 / jnp.sqrt(in_planes)
    bound2 = 1.0 / jnp.sqrt(hidden)
    # Stored already transposed: (in_features, out_features).
    w1 = jax.random.uniform(k1, (in_planes, hidden), jnp.float32, -bound1, bound1)
    b1 = jax.random.uniform(k2, (hidden,), jnp.float32, -bound1, bound1)
    w2 = jax.random.uniform(k3, (hidden, out_planes), jnp.float32, -bound2, bound2)
    b2 = jax.random.uniform(k4, (out_planes,), jnp.float32, -bound2, bound2)
    return w1, b1, w2, b2


if __name__ == "__main__":
    key = jax.random.PRNGKey(0)
    kx, kp = jax.random.split(key)

    B, C, H, W = 2, 4, 16, 16          # in_planes = C = 4
    out_planes, reduction = 32, 16     # hidden = 2

    x = jax.random.normal(kx, (B, C, H, W), jnp.float32)
    w1, b1, w2, b2 = init_params(kp, C, out_planes, reduction)

    y = filter_layer(x, w1, b1, w2, b2, out_planes)
    y = jax.block_until_ready(y)

    # Pure-JAX reference check.
    pooled = jnp.mean(x, axis=(2, 3)) + jnp.max(x, axis=(2, 3))
    ref = jax.nn.sigmoid(
        jnp.maximum(pooled @ w1 + b1, 0.0) @ w2 + b2
    ).reshape(B, out_planes, 1, 1)
    assert y.shape == (B, out_planes, 1, 1)
    assert jnp.allclose(y, ref, atol=1e-5), "mismatch vs reference"

    print("KERNEL_OK")
</pallas_src>

<mosaic_0001>
module attributes {stable_mosaic.version = 11 : i64} {
  func.func @filter_layer_kernel(%arg0: i32, %arg1: i32, %arg2: memref<1x4x256xf32, #tpu.memory_space<vmem>>, %arg3: memref<4x2xf32, #tpu.memory_space<vmem>>, %arg4: memref<1x2xf32, #tpu.memory_space<vmem>>, %arg5: memref<2x128xf32, #tpu.memory_space<vmem>>, %arg6: memref<1x128xf32, #tpu.memory_space<vmem>>, %arg7: memref<1x1x128xf32, #tpu.memory_space<vmem>>, %arg8: memref<1x4xf32, #tpu.memory_space<vmem>>, %arg9: memref<1x4xf32, #tpu.memory_space<vmem>>) attributes {dimension_semantics = [#tpu.dimension_semantics<parallel>, #tpu.dimension_semantics<arbitrary>], iteration_bounds = array<i64: 2, 1>, scalar_prefetch = 0 : i64, scratch_operands = 2 : i64, tpu.core_type = #tpu.core_type<tc>, window_params = [{transform_indices = @transform_0, window_bounds = array<i64: 1, 4, 256>}, {pipeline_mode = #tpu.pipeline_mode<synchronous>, transform_indices = @transform_1, window_bounds = array<i64: 4, 2>}, {pipeline_mode = #tpu.pipeline_mode<synchronous>, transform_indices = @transform_2, window_bounds = array<i64: 1, 2>}, {pipeline_mode = #tpu.pipeline_mode<synchronous>, transform_indices = @transform_3, window_bounds = array<i64: 2, 128>}, {pipeline_mode = #tpu.pipeline_mode<synchronous>, transform_indices = @transform_4, window_bounds = array<i64: 1, 128>}, {transform_indices = @transform_5, window_bounds = array<i64: 1, 1, 128>}]} {
    %c0_i32 = arith.constant 0 : i32
    %0 = arith.cmpi eq, %arg1, %c0_i32 : i32
    %1 = arith.extui %0 : i1 to i32
    %c0_i32_0 = arith.constant 0 : i32
    %2 = arith.cmpi ne, %1, %c0_i32_0 : i32
    scf.if %2 {
      %cst_14 = arith.constant 0.000000e+00 : f32
      %15 = vector.broadcast %cst_14 : f32 to vector<1x4xf32>
      %c0_15 = arith.constant 0 : index
      %c0_16 = arith.constant 0 : index
      %16 = vector.load %arg8[%c0_15, %c0_16] : memref<1x4xf32, #tpu.memory_space<vmem>>, vector<1x4xf32>
      tpu.vector_store %arg8[%c0_15, %c0_16], %15 {strides = array<i32>} : memref<1x4xf32, #tpu.memory_space<vmem>>, vector<1x4xf32>,
      %cst_17 = arith.constant 0xFF800000 : f32
      %17 = vector.broadcast %cst_17 : f32 to vector<1x4xf32>
      %c0_18 = arith.constant 0 : index
      %c0_19 = arith.constant 0 : index
      %18 = vector.load %arg9[%c0_18, %c0_19] : memref<1x4xf32, #tpu.memory_space<vmem>>, vector<1x4xf32>
      tpu.vector_store %arg9[%c0_18, %c0_19], %17 {strides = array<i32>} : memref<1x4xf32, #tpu.memory_space<vmem>>, vector<1x4xf32>,
    } else {
    }
    %c0 = arith.constant 0 : index
    %c0_1 = arith.constant 0 : index
    %c0_2 = arith.constant 0 : index
    %3 = vector.load %arg2[%c0, %c0_1, %c0_2] : memref<1x4x256xf32, #tpu.memory_space<vmem>>, vector<1x4x256xf32>
    %c0_3 = arith.constant 0 : index
    %c0_4 = arith.constant 0 : index
    %4 = vector.load %arg8[%c0_3, %c0_4] : memref<1x4xf32, #tpu.memory_space<vmem>>, vector<1x4xf32>
    %cst = arith.constant dense<0.000000e+00> : vector<1x4xf32>
    %5 = vector.multi_reduction <add>, %3, %cst [2] : vector<1x4x256xf32> to vector<1x4xf32>
    %6 = arith.addf %4, %5 : vector<1x4xf32>
    %c0_5 = arith.constant 0 : index
    %c0_6 = arith.constant 0 : index
    %7 = vector.load %arg8[%c0_5, %c0_6] : memref<1x4xf32, #tpu.memory_space<vmem>>, vector<1x4xf32>
    tpu.vector_store %arg8[%c0_5, %c0_6], %6 {strides = array<i32>} : memref<1x4xf32, #tpu.memory_space<vmem>>, vector<1x4xf32>,
    %c0_7 = arith.constant 0 : index
    %c0_8 = arith.constant 0 : index
    %8 = vector.load %arg9[%c0_7, %c0_8] : memref<1x4xf32, #tpu.memory_space<vmem>>, vector<1x4xf32>
    %cst_9 = arith.constant dense<0xFF800000> : vector<1x4xf32>
    %9 = vector.multi_reduction <maximumf>, %3, %cst_9 [2] : vector<1x4x256xf32> to vector<1x4xf32>
    %10 = arith.maximumf %8, %9 : vector<1x4xf32>
    %c0_10 = arith.constant 0 : index
    %c0_11 = arith.constant 0 : index
    %11 = vector.load %arg9[%c0_10, %c0_11] : memref<1x4xf32, #tpu.memory_space<vmem>>, vector<1x4xf32>
    tpu.vector_store %arg9[%c0_10, %c0_11], %10 {strides = array<i32>} : memref<1x4xf32, #tpu.memory_space<vmem>>, vector<1x4xf32>,
    %c0_i32_12 = arith.constant 0 : i32
    %12 = arith.cmpi eq, %arg1, %c0_i32_12 : i32
    %13 = arith.extui %12 : i1 to i32
    %c0_i32_13 = arith.constant 0 : i32
    %14 = arith.cmpi ne, %13, %c0_i32_13 : i32
    scf.if %14 {
      %c0_14 = arith.constant 0 : index
      %c0_15 = arith.constant 0 : index
      %15 = vector.load %arg8[%c0_14, %c0_15] : memref<1x4xf32, #tpu.memory_space<vmem>>, vector<1x4xf32>
      %cst_16 = arith.constant 3.906250e-03 : f32
      %16 = vector.broadcast %cst_16 : f32 to vector<1x4xf32>
      %17 = arith.mulf %15, %16 : vector<1x4xf32>
      %c0_17 = arith.constant 0 : index
      %c0_18 = arith.constant 0 : index
      %18 = vector.load %arg9[%c0_17, %c0_18] : memref<1x4xf32, #tpu.memory_space<vmem>>, vector<1x4xf32>
      %19 = arith.addf %17, %18 : vector<1x4xf32>
      %c0_19 = arith.constant 0 : index
      %c0_20 = arith.constant 0 : index
      %20 = vector.load %arg3[%c0_19, %c0_20] : memref<4x2xf32, #tpu.memory_space<vmem>>, vector<4x2xf32>
      %cst_21 = arith.constant dense<0.000000e+00> : vector<1x2xf32>
      %21 = tpu.matmul %19, %20, %cst_21 {dimension_numbers = #tpu.dot_dimension_numbers<[1], [0], [0], [1], [0, 0, 1, 1], [], []>} : vector<1x4xf32>, vector<4x2xf32>, vector<1x2xf32> -> vector<1x2xf32>
      %c0_22 = arith.constant 0 : index
      %c0_23 = arith.constant 0 : index
      %22 = vector.load %arg4[%c0_22, %c0_23] : memref<1x2xf32, #tpu.memory_space<vmem>>, vector<1x2xf32>
      %23 = arith.addf %21, %22 : vector<1x2xf32>
      %cst_24 = arith.constant 0.000000e+00 : f32
      %24 = vector.broadcast %cst_24 : f32 to vector<1x2xf32>
      %25 = arith.maximumf %23, %24 : vector<1x2xf32>
      %c0_25 = arith.constant 0 : index
      %c0_26 = arith.constant 0 : index
      %26 = vector.load %arg5[%c0_25, %c0_26] : memref<2x128xf32, #tpu.memory_space<vmem>>, vector<2x128xf32>
      %cst_27 = arith.constant dense<0.000000e+00> : vector<1x128xf32>
      %27 = tpu.matmul %25, %26, %cst_27 {dimension_numbers = #tpu.dot_dimension_numbers<[1], [0], [0], [1], [0, 0, 1, 1], [], []>} : vector<1x2xf32>, vector<2x128xf32>, vector<1x128xf32> -> vector<1x128xf32>
      %c0_28 = arith.constant 0 : index
      %c0_29 = arith.constant 0 : index
      %28 = vector.load %arg6[%c0_28, %c0_29] : memref<1x128xf32, #tpu.memory_space<vmem>>, vector<1x128xf32>
      %29 = arith.addf %27, %28 : vector<1x128xf32>
      %30 = arith.negf %29 : vector<1x128xf32>
      %31 = math.exp %30 : vector<1x128xf32>
      %cst_30 = arith.constant 1.000000e+00 : f32
      %32 = vector.broadcast %cst_30 : f32 to vector<1x128xf32>
      %33 = arith.addf %32, %31 : vector<1x128xf32>
      %34 = arith.divf %32, %33 : vector<1x128xf32>
      %c0_31 = arith.constant 0 : index
      %c0_32 = arith.constant 0 : index
      %c0_33 = arith.constant 0 : index
      %35 = vector.load %arg7[%c0_31, %c0_32, %c0_33] : memref<1x1x128xf32, #tpu.memory_space<vmem>>, vector<1x1x128xf32>
      %36 = vector.shape_cast %35 : vector<1x1x128xf32> to vector<1x128xf32>
      %37 = vector.shape_cast %34 : vector<1x128xf32> to vector<1x1x128xf32>
      tpu.vector_store %arg7[%c0_31, %c0_32, %c0_33], %37 {strides = array<i32>} : memref<1x1x128xf32, #tpu.memory_space<vmem>>, vector<1x1x128xf32>,
    } else {
    }
    return
  }
  func.func @transform_0(%arg0: i32, %arg1: i32) -> (i32, i32, i32) {
    %c0_i32 = arith.constant 0 : i32
    %c0_i32_0 = arith.constant 0 : i32
    return %arg0, %c0_i32, %arg1 : i32, i32, i32
  }
  func.func @transform_1(%arg0: i32, %arg1: i32) -> (i32, i32) {
    %c0_i32 = arith.constant 0 : i32
    %c0_i32_0 = arith.constant 0 : i32
    %c0_i32_1 = arith.constant 0 : i32
    return %c0_i32, %c0_i32_0 : i32, i32
  }
  func.func @transform_2(%arg0: i32, %arg1: i32) -> (i32, i32) {
    %c0_i32 = arith.constant 0 : i32
    %c0_i32_0 = arith.constant 0 : i32
    %c0_i32_1 = arith.constant 0 : i32
    return %c0_i32, %c0_i32_0 : i32, i32
  }
  func.func @transform_3(%arg0: i32, %arg1: i32) -> (i32, i32) {
    %c0_i32 = arith.constant 0 : i32
    %c0_i32_0 = arith.constant 0 : i32
    %c0_i32_1 = arith.constant 0 : i32
    return %c0_i32, %c0_i32_0 : i32, i32
  }
  func.func @transform_4(%arg0: i32, %arg1: i32) -> (i32, i32) {
    %c0_i32 = arith.constant 0 : i32
    %c0_i32_0 = arith.constant 0 : i32
    %c0_i32_1 = arith.constant 0 : i32
    return %c0_i32, %c0_i32_0 : i32, i32
  }
  func.func @transform_5(%arg0: i32, %arg1: i32) -> (i32, i32, i32) {
    %c0_i32 = arith.constant 0 : i32
    %c0_i32_0 = arith.constant 0 : i32
    %c0_i32_1 = arith.constant 0 : i32
    return %arg0, %c0_i32, %c0_i32_0 : i32, i32, i32
  }
}

</mosaic_0001>

<bundles_post_ra>
// kernel: tpu_custom_call.1
= control target key start
LH: loop header
LB: loop body
LE: loop exit
PB: predicated region body
PF: predicated region fallthrough
CT: control target
= control target key end

     0   :  { %10 = vsyncpa [#allocation5], 0  ;;  %s1093_s0 = inlined_call_operand.hbm [shape: f32[2,4,256], index: 0, kind: input, shape index: {}]   ;;  %s1094_s1 = inlined_call_operand.vmem [shape: f32[4,2], index: 1, kind: input, shape index: {}]   ;;  %s1095_s2 = inlined_call_operand.vmem [shape: f32[1,2], index: 2, kind: input, shape index: {}]   ;;  %s1096_s3 = inlined_call_operand.vmem [shape: f32[2,128], index: 3, kind: input, shape index: {}]   ;;  %s1097_s4 = inlined_call_operand.vmem [shape: f32[1,128], index: 4, kind: input, shape index: {}]   ;;  %s1098_s5 = inlined_call_operand.hbm [shape: f32[2,1,128], index: 5, kind: output, shape index: {}]  }
   0x1   :  { %12 = vsyncpa [#allocation5 + $0x1], 0 }
   0x2   :  { %13 = vsyncpa [#allocation6], 0 }
   0x3   :  { %15 = vsyncpa [#allocation6 + $0x1], 0  ;;  %s931_s18 = smov 0   ;;  %s933_s19 = smov 0  }
   0x4   :  { %s935_s20 = smov 0   ;;  %s937_s21 = smov 0  }
   0x5   :  { %s939_s22 = smov 0   ;;  %s941_s23 = smov 0  }
   0x6 LB: > { %s678_s24 = sadd.s32 4294967295, %s892_s23   ;;  %s679_s25 = sadd.s32 4294967294, %s892_s23   ;;  %s892_s23 = sphi %s941_s23, %s21_s23   ;;  %s888_s22 = sphi %s939_s22, %s1110_s22   ;;  %s884_s21 = sphi %s937_s21, %s1109_s21   ;;  %s880_s20 = sphi %s935_s20, %s1108_s20   ;;  %s876_s19 = sphi %s933_s19, %s1107_s19   ;;  %s872_s18 = sphi %s931_s18, %s1106_s18  }
   0x7   : > { %s33_s26 = sadd.s32 1, %s888_s22  ;;  %s42_s27 = sadd.s32 1, %s880_s20 }
   0x8   : > { %p35_p0 = scmp.ge.s32.totalorder %s33_s26, 2  ;;  %p49_p1 = scmp.ne.s32.totalorder %s880_s20, %s876_s19 }
   0x9   : > { %p50_p2 = scmp.eq.s32.totalorder %s892_s23, 0  ;;  %p55_p3 = scmp.ne.s32.totalorder %s876_s19, %s872_s18 }
   0xa   : > { %s1112_s26 = smov (%p35_p0, %s33_s26), 0  ;;  %p56_p5 = scmp.eq.s32.totalorder %s678_s24, 0 }
   0xb   : > { %p972_p4 = por %p50_p2, %p49_p1  ;;  %s37_s29 = ssub.s32 %s888_s22, %s1112_s26 }
   0xc   : > { %p163_p6 = scmp.eq.s32.totalorder %s678_s24, 1  ;;  %p40_p7 = scmp.eq.s32.totalorder %s37_s29, 0 }
   0xd   : > { %p978_p8 = por %p56_p5, %p55_p3  ;;  %p169_p10 = scmp.eq.s32.totalorder %s679_s25, 1 }
   0xe   : > { %p982_p9 = por %p163_p6, %p49_p1  ;;  %p722_p13 = scmp.lt.s32.totalorder %s892_s23, 2 }
   0xf   : > { %s987_s7 = scalar_select %p40_p7, %s880_s20, %s42_s27  }
  0x10   : > { %p989_p11 = por %p169_p10, %p55_p3  ;;  %s201_s9 = sand.u32 1, %s880_s20  }
  0x11   : > { %s682_s10 = sshll.u32 %s201_s9, 3  ;;  %s695_s11 = sshll.u32 %s888_s22, 7 }
  0x12   : > { %s1102_s8 = scalar_select %p989_p11, 1, 0 }
  0x13   : > { %s213_s14 = scalar_lea.hbm %s1093_s0, %s695_s11  ;;  %s205_s15 = scalar_lea.vmem [#allocation4], %s682_s10 }
  0x14   : > { %s215_s16 = sshll.u32 %s205_s15, 4  ;;  %p1002_p0 = pnand %p722_p13, %p972_p4  ;;  %s216_s16 = int_to_ptr.vmem [resolvable:$true] %s215_s16 }
  0x15   : > { %p685_p1 = scmp.ge.s32.totalorder %s892_s23, 1  ;;  %p220_p2 = scmp.lt.s32.totalorder %s892_s23, 3 }
  0x16   : > { %s202_s24 = scalar_lea.sflag [#allocation5], %s201_s9  ;;  %p786_p3 = pneg %p1002_p0 }
  0x17   : > { %s797_s25 = scalar_lea.vmem %s216_s16, 128  ;;  %s894_s27 = smov [#allocation4]  }
  0x18   : > { %p798_p5 = scmp.ne.s32.totalorder %s216_s16, %s797_s25  ;;  %s802_s29 = sshll.u32 %s894_s27, 4  ;;  %s803_s29 = int_to_ptr.vmem [resolvable:$false] %s802_s29 }
  0x19   : > { %s804_s10 = scalar_lea.vmem %s803_s29, 256  ;;  %p805_p10 = scmp.lt.s32.totalorder %s216_s16, %s803_s29 }
  0x1a   : > { %p800_p6 = pnand %p798_p5, %p786_p3  ;;  %p806_p12 = scmp.lt.s32.totalorder %s804_s10, %s797_s25 }
  0x1c   : > { %p801_p7 = pneg %p800_p6  ;;  %p807_p4 = por %p806_p12, %p805_p10 }
  0x1e   : > { %p808_p13 = pnand %p807_p4, %p801_p7 }
  0x20   : > { %811 = shalt.err (!%p808_p13)
}
  0x21   : > { %717 = dma.hbm_to_vmem [thread:$0]  (!%p1002_p0), %s213_s14, 128, %s216_s16, %s202_s24  }
  0x22   : > { %p221_p11 = pnand %p685_p1, %p220_p2 }
  0x23   : > { %s1017_s28 = sand.u32 (!%p221_p11), 1, %s876_s19  }
  0x24   : > { %224 = sbr.rel (%p221_p11) target bundleno = 780 (0x30c), region = 40  ;;  %s686_s9 = sshll.u32 (!%p221_p11), %s1017_s28, 3 }
  0x25   : > { %s227_s11 = scalar_lea.sflag (!%p221_p11), [#allocation5], %s1017_s28  ;;  %s230_s12 = scalar_lea.vmem (!%p221_p11), [#allocation4], %s686_s9 }
  0x29   : > { %863 = dma.done.wait (%p978_p8), %s227_s11, 128  }
  0x2a   : > { %865 = vsyncadd (%p978_p8), %s227_s11, 4294967168  ;;  %vm269_vm0 = vcmask 1043456   ;;  %v264_v0 = vld [vmem:[%s230_s12] sm:$0xff]  ;;  %v895_v8 = vmov 0   ;;  %v276_v9 = vlaneseq  ;;  %v896_v13 = vmov 1966171168  }
  0x2b   : > { %v267_v1 = vcombine.high %v264_v0, %v264_v0  ;;  %v270_v2 = vsel %vm269_vm0, %v264_v0, 0.0  ;;  %v344_v4 = vsel %vm269_vm0, %v264_v0, -inf  ;;  %777 = vset.pattern.permute.xlu1 %v895_v8  ;;  %778 = vset.pattern.permute.xlu0 %v895_v8  ;;  %v295_v14 = vunpack.c.l.s4 %v896_v13  ;;  %v421_v45 = vld [vmem:[%s1094_s1] sm:$0xf]  ;;  %s692_s27 = sshll.u32 %s884_s21, 4  ;;  %s255_s29 = scalar_lea.vmem [#allocation7], %s1017_s28 }
  0x2c   : > { %v277_v10 = vshrl.u32 %v276_v9, 7  ;;  %v320_v11 = vand.u32 127, %v276_v9  ;;  %vm261_vm1 = vcmask 24576   ;;  %v897_v37 = vmov 0.0   ;;  %v501_v62 = vld [vmem:[%s1096_s3] sm:$0x3]  ;;  %s1051_s12 = scalar_lea.hbm %s1098_s5, %s692_s27 }
  0x2d   : > { %v271_v3 = vsel %vm269_vm0, %v267_v1, 0.0  ;;  %v345_v5 = vsel %vm269_vm0, %v267_v1, -inf  ;;  %v296_v19 = vunpack.c.0.s8 %v295_v14  ;;  %262 = vst.msk [vmem:[#allocation2] sm:$0x1] %vm261_vm1, %v897_v37  ;;  %700 = vmatprep.subr.mxu0 %v897_v37  ;;  %705 = vmatprep.subr.mxu1 %v897_v37  ;;  %v898_v42 = vmov -inf   ;;  %s601_s10 = sshll.u32 %s255_s29, 4  ;;  %s602_s10 = int_to_ptr.vmem [resolvable:$true] %s601_s10 }
  0x2e   : > { %v272_v6 = vadd.f32 %v271_v3, %v270_v2  ;;  %v346_v7 = vmax.f32 %v344_v4, %v345_v5  ;;  %v323_v12 = vsub.s32 %v320_v11, %v277_v10  ;;  %v278_v15 = vsub.s32 0, %v277_v10  ;;  %263 = vst.msk [vmem:[#allocation3] sm:$0x1] %vm261_vm1, %v898_v42  ;;  %701 = vmatpush3.msk.msra.mxu0 %vm269_vm0, %v421_v45  ;;  %v422_v63 = vld [vmem:[%s1095_s2] sm:$0x1]  ;;  %s589_s30 = scalar_lea.sflag [#allocation6], %s1017_s28 }
  0x2f   : > { %v282_v16 = vsub.s32 1, %v277_v10  ;;  %v286_v17 = vsub.s32 2, %v277_v10  ;;  %v290_v18 = vsub.s32 3, %v277_v10  ;;  %v299_v25 = vsub.s32 %v296_v19, %v277_v10  ;;  %v502_v4 = vld [vmem:[%s1097_s4] sm:$0x1]  ;;  %s812_s13 = scalar_lea.vmem %s602_s10, 16 }
  0x30   : > { %273 = vadd.xlane.f32.xlu0 %v272_v6  ;;  %vm899_vm2 = vmmov 0   ;;  %vm423_vm3 = vcmask 31744   ;;  %vm507_vm4 = vcmask 1041408   ;;  %vm503_vm5 = vcmask 15360   ;;  %p813_p8 = scmp.ne.s32.totalorder %s602_s10, %s812_s13  ;;  %s900_s14 = smov [#allocation7]  }
  0x31   : > { %702 = vmatprep.mubr.msk.f32.mxu0 %vm899_vm2, %v897_v37  ;;  %707 = vmatprep.mubr.msk.f32.mxu1 %vm899_vm2, %v897_v37  ;;  %s816_s15 = sshll.u32 %s900_s14, 4  ;;  %s817_s15 = int_to_ptr.vmem [resolvable:$false] %s816_s15 }
  0x32   : > { %706 = vmatpush3.msk.msra.mxu1 %vm507_vm4, %v501_v62  ;;  %p814_p11 = pnand %p813_p8, %p982_p9  ;;  %s818_s21 = scalar_lea.vmem %s817_s15, 32 }
  0x33   : > { %p819_p0 = scmp.lt.s32.totalorder %s602_s10, %s817_s15  ;;  %p820_p1 = scmp.lt.s32.totalorder %s818_s21, %s812_s13 }
  0x34   : > { %347 = vmax.xlane.f32.xlu0 %v346_v7  ;;  %v265_v50 = vld [vmem:[#allocation2] sm:$0x1]  ;;  %p815_p12 = pneg %p814_p11 }
  0x35   : > { %v343_v55 = vld [vmem:[#allocation3] sm:$0x1]  ;;  %p821_p2 = por %p820_p1, %p819_p0 }
  0x37   : > { %p822_p3 = pnand %p821_p2, %p815_p12 }
  0xb9   : > { %v274_v20 = vpop.xlane.xlu0 %273 }
  0xba   : > { %v279_v21 = vrot.slane %v274_v20, %v278_v15  ;;  %v283_v22 = vrot.slane %v274_v20, %v282_v16  ;;  %v287_v23 = vrot.slane %v274_v20, %v286_v17  ;;  %v291_v24 = vrot.slane %v274_v20, %v290_v18 }
  0xbc   : > { %v292_v26 = vcombine.low %v279_v21, %v283_v22  ;;  %v293_v27 = vcombine.low %v287_v23, %v291_v24 }
  0xbd   : > { %v348_v28 = vpop.xlane.xlu0 %347 }
  0xbe   : > { %v353_v29 = vrot.slane %v348_v28, %v278_v15  ;;  %v357_v30 = vrot.slane %v348_v28, %v282_v16  ;;  %v361_v31 = vrot.slane %v348_v28, %v286_v17  ;;  %v365_v32 = vrot.slane %v348_v28, %v290_v18 }
  0xbf   : > { %v300_v33 = vrot.slane %v292_v26, %v299_v25  ;;  %v307_v34 = vrot.slane %v293_v27, %v299_v25 }
  0xc0   : > { %v366_v35 = vcombine.low %v353_v29, %v357_v30  ;;  %v367_v36 = vcombine.low %v361_v31, %v365_v32 }
  0xc1   : > { %v308_v38 = vcombine.low %v300_v33, %v307_v34 }
  0xc2   : > { %v374_v39 = vrot.slane %v366_v35, %v299_v25  ;;  %v381_v40 = vrot.slane %v367_v36, %v299_v25 }
  0xc3   : > { %v315_v41 = vrot.slane %v308_v38, %v299_v25 }
  0xc4   : > { %v382_v43 = vcombine.low %v374_v39, %v381_v40 }
  0xc5   : > { %317 = vperm.xlu1 %777, %v315_v41  }
  0xc6   : > { %v389_v44 = vrot.slane %v382_v43, %v299_v25 }
  0xc9   : > { %391 = vperm.xlu1 %777, %v389_v44  }
 0x140   : > { %v318_v46 = vpop.permute.xlu1 %317 }
 0x141   : > { %v324_v47 = vrot.slane %v318_v46, %v323_v12 }
 0x143   : > { %v331_v48 = vrot.slane %v324_v47, %v299_v25 }
 0x144   : > { %v392_v49 = vpop.permute.xlu1 %391 }
 0x145   : > { %v338_v51 = vrot.slane %v331_v48, %v299_v25  ;;  %v396_v52 = vrot.slane %v392_v49, %v323_v12 }
 0x147   : > { %v403_v53 = vrot.slane %v396_v52, %v299_v25  ;;  %v340_v54 = vadd.f32 %v338_v51, %v265_v50 }
 0x149   : > { %v410_v56 = vrot.slane %v403_v53, %v299_v25  ;;  %342 = vst.msk [vmem:[#allocation2] sm:$0x1] %vm261_vm1, %v340_v54 }
 0x14b   : > { %v412_v57 = vmax.f32 %v343_v55, %v410_v56 }
 0x14d   : > { %413 = vst.msk [vmem:[#allocation3] sm:$0x1] %vm261_vm1, %v412_v57 }
 0x150   : > { %v417_v58 = vld [vmem:[#allocation2] sm:$0x1] }
 0x151   : > { %v418_v59 = vmul.f32 0.00390625, %v417_v58 }
 0x154   : > { %v419_v60 = vld [vmem:[#allocation3] sm:$0x1] }
 0x155   : > { %v420_v61 = vadd.f32 %v419_v60, %v418_v59 }
 0x157   : > { %703 = vmatmul.mubr.msk.f32.vlgmr.msra.gmra.mxu0 %vm423_vm3, %v420_v61 }
 0x217   : > { %v496_v0 = vpop.f32.mrf.mxu0 }
 0x218   : > { %v497_v1 = vadd.f32 %v496_v0, %v422_v63 }
 0x219   : > { %v704_v2 = vpop.f32.mrf.mxu0 }
 0x21a   : > { %v500_v3 = vmax.f32 %v497_v1, 0.0 }
 0x21c   : > { %708 = vmatmul.mubr.msk.f32.vlgmr.msra.gmra.mxu1 %vm503_vm5, %v500_v3 }
 0x2dc   : > { %v577_v5 = vpop.f32.mrf.mxu1 }
 0x2dd   : > { %v578_v6 = vadd.f32 %v577_v5, %v502_v4 }
 0x2de   : > { %v709_v7 = vpop.f32.mrf.mxu1 }
 0x2df   : > { %v691_v8 = vmul.f32 -1.442695, %v578_v6 }
 0x2e1   : > { %780 = vpow2.f32 %v691_v8 }
 0x2ee   : > { %v781_v9 = vpop.eup %780 }
 0x2ef   : > { %v584_v10 = vadd.f32 1.0, %v781_v9 }
 0x2f1   : > { %782 = vrcp.f32 %v584_v10 }
 0x2fe   : > { %v783_v11 = vpop.eup %782 }
 0x2ff   : > { %587 = vst [vmem:[%s255_s29] sm:$0x1] %v783_v11 }
 0x300   : > { %825 = shalt.err (!%p822_p3)
}
 0x301   : > { %s826_s16 = scalar_lea.hbm %s1051_s12, 16  ;;  %s830_s24 = scalar_lea.hbm %s1098_s5, 32 }
 0x302   : > { %p827_p5 = scmp.ne.s32.totalorder %s1051_s12, %s826_s16  ;;  %p831_p10 = scmp.lt.s32.totalorder %s1051_s12, %s1098_s5 }
 0x303   : > { %p832_p4 = scmp.lt.s32.totalorder %s830_s24, %s826_s16 }
 0x304   : > { %p828_p6 = pnand %p827_p5, %p982_p9 }
 0x305   : > { %p833_p13 = por %p832_p4, %p831_p10 }
 0x306   : > { %p829_p7 = pneg %p828_p6 }
 0x308   : > { %p834_p8 = pnand %p833_p13, %p829_p7 }
 0x30a   : > { %837 = shalt.err (!%p834_p8)
}
 0x30b   : > { %712 = dma.vmem_to_hbm [thread:$0]  (%p982_p9), %s602_s10, 16, %s1051_s12, %s589_s30  }
 0x30c PF: > { %s613_s29 = sand.u32 1, %s872_s18   ;;  %p1104_p11 = scmp.ne.s32.totalorder %s1102_s8, 0 }
 0x30d   : > { %p1105_p12 = scmp.ge.s32.totalorder %s892_s23, 2  ;;  %s614_s9 = scalar_lea.sflag [#allocation6], %s613_s29 }
 0x30f   : > { %p719_p0 = pnand %p1105_p12, %p1104_p11 }
 0x311   : > { %p720_p1 = pneg %p719_p0 }
 0x313   : > { %867 = dma.done.wait (%p720_p1), %s614_s9, 16  }
 0x314   : > { %869 = vsyncadd (%p720_p1), %s614_s9, 4294967280  ;;  %s21_s23 = sadd.s32 1, %s892_s23   ;;  %s1106_s18 = smov %s876_s19 }
 0x315   : > { %p18_p2 = scmp.ge.s32.totalorder %s21_s23, 4   ;;  %s1107_s19 = smov %s880_s20 }
 0x316   : > { %s1108_s20 = smov %s987_s7  ;;  %s1109_s21 = smov %s888_s22 }
 0x317   : > { %s1110_s22 = smov %s1112_s26  ;;  %20 = sbr.rel (!%p18_p2) target bundleno = 6 (0x6), region = 93 }
 0x31c   :  { %618 = vsyncpa [#allocation5], 1 }
 0x31d   :  { %620 = vsyncpa [#allocation5 + $0x1], 1 }
 0x31e   :  { %621 = vsyncpa [#allocation6], 1 }
 0x31f   :  { %623 = vsyncpa [#allocation6 + $0x1], 1 }

</bundles_post_ra>
